<compile_context>
chip_gen: v6e
topology: v6e:2x2x1
jax: 0.10.0
libtpu: 0.0.40
codegen_flags: <defaults>
</compile_context>

<pallas_src>
import jax
import jax.numpy as jnp
from jax import lax
from jax.experimental import pallas as pl
from jax.experimental.pallas import tpu as pltpu

C_PAD = 128                     # lane-dense feature width for all intermediates
KSIZES = (2, 3, 4)              # Conv1d kernel sizes
N_CH = 2                        # out_channels per conv
N_FEAT = len(KSIZES) * N_CH     # 6  (concat feature width)
N_CLS = 3                       # fc output width
MAX_K = max(KSIZES)             # number of taps (dk = 0..3)


def textcnn_kernel(tok_ref, fused_ref, mask_ref, fcw_ref, fcb_ref, out_ref):
    """Fused embedding-gather + conv taps + masked max-pool + FC for one tile.

    tok_ref   : (Bt*L, MAX_K)        int32  column dk = token id at time t+dk
    fused_ref : (MAX_K*V_pad, C_PAD) f32    tap-dk block maps token v directly
                                            to final feature lanes 0..5
    mask_ref  : (1, L, C_PAD)        f32    additive {0, -1e30} validity mask
    fcw_ref   : (C_PAD, C_PAD)       f32    fc.weight.T zero-padded
    fcb_ref   : (1, C_PAD)           f32    fc.bias + folded conv bias
    out_ref   : (Bt, C_PAD)          f32    logits in lanes 0..2 (lane-dense)
    """
    btl, n_tap = tok_ref.shape
    v_pad = fused_ref.shape[0] // n_tap
    bt, c_pad = out_ref.shape
    seq = btl // bt

    # One-hot over the 4 shifted token streams, lane-concatenated -> (btl, 4*V_pad).
    tok = tok_ref[...]                                               # (btl, MAX_K)
    vid = lax.broadcasted_iota(jnp.int32, (btl, v_pad), 1)
    oh = jnp.concatenate(
        [(tok[:, dk:dk + 1] == vid).astype(jnp.float32) for dk in range(n_tap)],
        axis=1)

    # Single MXU pass: embedding gather + all conv taps, already time-aligned.
    s = jnp.dot(oh, fused_ref[...], preferred_element_type=jnp.float32)  # (btl, C_PAD)

    # Masked full-extent max pool over time (mask is precomputed, grid-invariant).
    s3 = s.reshape(bt, seq, c_pad)
    pooled = jnp.max(s3 + mask_ref[...], axis=1)                     # (bt, C_PAD)

    # TODO(synk): Dropout(0.5) is identity in eval mode; training-mode mask not emitted.
    # FC against the zero-padded weight; conv bias already folded into fcb.
    out_ref[...] = (jnp.dot(pooled, fcw_ref[...],
                            preferred_element_type=jnp.float32)
                    + fcb_ref[...])


def pack_params(params, max_len):
    """One-time repack of PyTorch-shaped parameters into the fused kernel layout."""
    vocab, emb_dim = params["embedding"].shape
    v_pad = pl.cdiv(vocab, C_PAD) * C_PAD

    tbl = jnp.zeros((v_pad, emb_dim), jnp.float32)
    tbl = tbl.at[:vocab].set(params["embedding"].astype(jnp.float32))

    # fused[dk, v, 2*k_idx + c] = sum_e tbl[v, e] * conv_k.weight[c, e, dk]
    fused = jnp.zeros((MAX_K, v_pad, C_PAD), jnp.float32)
    bias_row = jnp.zeros((1, C_PAD), jnp.float32)
    for k_idx, k in enumerate(KSIZES):
        w = params[f"conv{k}_w"].astype(jnp.float32)                 # (2, E, k)
        b = params[f"conv{k}_b"].astype(jnp.float32)                 # (2,)
        lo, hi = N_CH * k_idx, N_CH * (k_idx + 1)
        for dk in range(k):
            fused = fused.at[dk, :, lo:hi].set(tbl @ w[:, :, dk].T)  # (V_pad, 2)
        bias_row = bias_row.at[0, lo:hi].set(b)
    fused = fused.reshape(MAX_K * v_pad, C_PAD)

    # FC weight padded to (128,128); conv bias folded into the FC bias (exact:
    # max over time and a per-feature constant bias commute).
    fcw = jnp.zeros((C_PAD, C_PAD), jnp.float32)
    fcw = fcw.at[:N_FEAT, :N_CLS].set(params["fc_w"].astype(jnp.float32).T)
    fcb = jnp.zeros((1, C_PAD), jnp.float32)
    fcb = fcb.at[0, :N_CLS].set(params["fc_b"].astype(jnp.float32))
    fcb = bias_row @ fcw + fcb

    # Additive time-validity mask: feature lanes of conv k are valid for
    # t <= max_len - k; padding lanes (>=6) stay 0 (they hit zero fc rows).
    t = jnp.arange(max_len)[:, None]                                 # (L, 1)
    mask = jnp.zeros((1, max_len, C_PAD), jnp.float32)
    for k_idx, k in enumerate(KSIZES):
        lo, hi = N_CH * k_idx, N_CH * (k_idx + 1)
        vals = jnp.where(t > max_len - k, jnp.float32(-1e30), jnp.float32(0.0))
        mask = mask.at[0, :, lo:hi].set(jnp.broadcast_to(vals, (max_len, N_CH)))

    return {"fused": fused, "mask": mask, "fcw": fcw, "fcb": fcb}


def textcnn_forward(tokens, packed, *, batch_tile=32):
    batch, seq = tokens.shape
    assert seq >= MAX_K, f"maxLen must be >= {MAX_K} (PyTorch conv would error otherwise)"

    # Sublane-aligned tile; clamp so tiny batches don't pay for a huge tile,
    # while large batches get M = batch_tile*seq >= 256 rows per MXU pass.
    batch_tile = max(8, min((batch_tile // 8) * 8, pl.cdiv(batch, 8) * 8))
    b_pad = pl.cdiv(batch, batch_tile) * batch_tile
    btl = batch_tile * seq

    tok = jnp.zeros((b_pad, seq), jnp.int32).at[:batch, :].set(tokens.astype(jnp.int32))
    # Shifted token streams: column dk = token at t+dk (0-padded past the end;
    # those taps only feed conv windows that the time mask removes).
    tok_ext = jnp.concatenate([tok, jnp.zeros((b_pad, MAX_K - 1), jnp.int32)], axis=1)
    tok_sh = jnp.stack([tok_ext[:, dk:dk + seq] for dk in range(MAX_K)], axis=-1)
    tok_sh = tok_sh.reshape(b_pad * seq, MAX_K)

    fused, mask, fcw, fcb = packed["fused"], packed["mask"], packed["fcw"], packed["fcb"]

    out = pl.pallas_call(
        textcnn_kernel,
        out_shape=jax.ShapeDtypeStruct((b_pad, C_PAD), jnp.float32),
        grid=(b_pad // batch_tile,),
        in_specs=[
            pl.BlockSpec((btl, MAX_K), lambda i: (i, 0)),            # shifted token ids
            pl.BlockSpec(fused.shape, lambda i: (0, 0)),             # fused embed*conv weights
            pl.BlockSpec(mask.shape, lambda i: (0, 0, 0)),           # additive time mask
            pl.BlockSpec(fcw.shape, lambda i: (0, 0)),               # padded fc weight
            pl.BlockSpec(fcb.shape, lambda i: (0, 0)),               # fc bias (+ folded conv bias)
        ],
        out_specs=pl.BlockSpec((batch_tile, C_PAD), lambda i: (i, 0)),
        compiler_params=pltpu.CompilerParams(
            dimension_semantics=("parallel",),
            vmem_limit_bytes=32 * 1024 * 1024),
    )(tok_sh, fused, mask, fcw, fcb)
    return out[:batch, :N_CLS]


def init_params(key, vocab_size, embedding_dim):
    """Deterministic synthetic parameters matching the PyTorch module's shapes."""
    ks = jax.random.split(key, 9)
    e = embedding_dim

    def uniform(k, shape, bound):
        return jax.random.uniform(k, shape, jnp.float32, -bound, bound)

    params = {"embedding": jax.random.normal(ks[0], (vocab_size, e), jnp.float32)}
    for i, k in enumerate(KSIZES):
        bound = 1.0 / (e * k) ** 0.5
        params[f"conv{k}_w"] = uniform(ks[1 + 2 * i], (N_CH, e, k), bound)   # (2,E,k)
        params[f"conv{k}_b"] = uniform(ks[2 + 2 * i], (N_CH,), bound)        # (2,)
    bound = 1.0 / N_FEAT ** 0.5
    params["fc_w"] = uniform(ks[7], (N_CLS, N_FEAT), bound)                  # (3,6)
    params["fc_b"] = uniform(ks[8], (N_CLS,), bound)                         # (3,)
    return params


def reference_forward(tokens, params):
    """Pure-JAX reference mirroring the PyTorch forward (eval mode)."""
    emb = params["embedding"][tokens]                              # (B, L, E)
    seq = emb.shape[1]
    feats = []
    for k in KSIZES:
        w = params[f"conv{k}_w"]                                   # (2, E, k)
        b = params[f"conv{k}_b"]                                   # (2,)
        lout = seq - k + 1
        conv = sum(jnp.einsum("ble,ce->bcl", emb[:, dk:dk + lout, :], w[:, :, dk])
                   for dk in range(k)) + b[None, :, None]          # (B, 2, Lout)
        feats.append(jnp.max(conv, axis=-1))                       # (B, 2)
    feat = jnp.concatenate(feats, axis=1)                          # (B, 6)
    return feat @ params["fc_w"].T + params["fc_b"]                # (B, 3)


if __name__ == "__main__":
    # Small config: vocab=50, embedding_dim=32, maxLen=8, batch=2
    VOCAB, EMB_DIM, MAX_LEN, BATCH = 50, 32, 8, 2

    key = jax.random.PRNGKey(0)
    pkey, tkey = jax.random.split(key)
    params = init_params(pkey, VOCAB, EMB_DIM)
    tokens = jax.random.randint(tkey, (BATCH, MAX_LEN), 0, VOCAB, dtype=jnp.int32)

    packed = pack_params(params, MAX_LEN)
    out = jax.block_until_ready(jax.jit(textcnn_forward)(tokens, packed))
    assert out.shape == (BATCH, N_CLS) and out.dtype == jnp.float32

    ref = jax.block_until_ready(reference_forward(tokens, params))
    assert jnp.allclose(out, ref, atol=1e-3, rtol=1e-3), (out, ref)
    print("KERNEL_OK")
</pallas_src>

<mosaic_0001>
module attributes {stable_mosaic.version = 11 : i64} {
  func.func @textcnn_kernel(%arg0: i32, %arg1: memref<64x4xi32, #tpu.memory_space<vmem>>, %arg2: memref<512x128xf32, #tpu.memory_space<vmem>>, %arg3: memref<1x8x128xf32, #tpu.memory_space<vmem>>, %arg4: memref<128x128xf32, #tpu.memory_space<vmem>>, %arg5: memref<1x128xf32, #tpu.memory_space<vmem>>, %arg6: memref<8x128xf32, #tpu.memory_space<vmem>>) attributes {dimension_semantics = [#tpu.dimension_semantics<parallel>], iteration_bounds = array<i64: 1>, scalar_prefetch = 0 : i64, scratch_operands = 0 : i64, tpu.core_type = #tpu.core_type<tc>, window_params = [{transform_indices = @transform_0, window_bounds = array<i64: 64, 4>}, {pipeline_mode = #tpu.pipeline_mode<synchronous>, transform_indices = @transform_1, window_bounds = array<i64: 512, 128>}, {pipeline_mode = #tpu.pipeline_mode<synchronous>, transform_indices = @transform_2, window_bounds = array<i64: 1, 8, 128>}, {pipeline_mode = #tpu.pipeline_mode<synchronous>, transform_indices = @transform_3, window_bounds = array<i64: 128, 128>}, {pipeline_mode = #tpu.pipeline_mode<synchronous>, transform_indices = @transform_4, window_bounds = array<i64: 1, 128>}, {transform_indices = @transform_5, window_bounds = array<i64: 8, 128>}]} {
    %c0 = arith.constant 0 : index
    %c0_0 = arith.constant 0 : index
    %0 = vector.load %arg1[%c0, %c0_0] : memref<64x4xi32, #tpu.memory_space<vmem>>, vector<64x4xi32>
    %1 = tpu.iota {dimensions = array<i32: 1>} : vector<64x128xi32>
    %2 = vector.extract_strided_slice %0 {offsets = [0, 0], sizes = [64, 1], strides = [1, 1]} : vector<64x4xi32> to vector<64x1xi32>
    %3 = vector.broadcast %2 : vector<64x1xi32> to vector<64x128xi32>
    %4 = arith.cmpi eq, %3, %1 : vector<64x128xi32>
    %5 = arith.extui %4 : vector<64x128xi1> to vector<64x128xi32>
    %6 = arith.sitofp %5 : vector<64x128xi32> to vector<64x128xf32>
    %7 = vector.extract_strided_slice %0 {offsets = [0, 1], sizes = [64, 1], strides = [1, 1]} : vector<64x4xi32> to vector<64x1xi32>
    %8 = vector.broadcast %7 : vector<64x1xi32> to vector<64x128xi32>
    %9 = arith.cmpi eq, %8, %1 : vector<64x128xi32>
    %10 = arith.extui %9 : vector<64x128xi1> to vector<64x128xi32>
    %11 = arith.sitofp %10 : vector<64x128xi32> to vector<64x128xf32>
    %12 = vector.extract_strided_slice %0 {offsets = [0, 2], sizes = [64, 1], strides = [1, 1]} : vector<64x4xi32> to vector<64x1xi32>
    %13 = vector.broadcast %12 : vector<64x1xi32> to vector<64x128xi32>
    %14 = arith.cmpi eq, %13, %1 : vector<64x128xi32>
    %15 = arith.extui %14 : vector<64x128xi1> to vector<64x128xi32>
    %16 = arith.sitofp %15 : vector<64x128xi32> to vector<64x128xf32>
    %17 = vector.extract_strided_slice %0 {offsets = [0, 3], sizes = [64, 1], strides = [1, 1]} : vector<64x4xi32> to vector<64x1xi32>
    %18 = vector.broadcast %17 : vector<64x1xi32> to vector<64x128xi32>
    %19 = arith.cmpi eq, %18, %1 : vector<64x128xi32>
    %20 = arith.extui %19 : vector<64x128xi1> to vector<64x128xi32>
    %21 = arith.sitofp %20 : vector<64x128xi32> to vector<64x128xf32>
    %22 = tpu.concatenate %6, %11, %16, %21 in 1 : vector<64x128xf32>, vector<64x128xf32>, vector<64x128xf32>, vector<64x128xf32> -> vector<64x512xf32>
    %c0_1 = arith.constant 0 : index
    %c0_2 = arith.constant 0 : index
    %23 = vector.load %arg2[%c0_1, %c0_2] : memref<512x128xf32, #tpu.memory_space<vmem>>, vector<512x128xf32>
    %cst = arith.constant dense<0.000000e+00> : vector<64x128xf32>
    %24 = tpu.matmul %22, %23, %cst {dimension_numbers = #tpu.dot_dimension_numbers<[1], [0], [0], [1], [0, 0, 1, 1], [], []>} : vector<64x512xf32>, vector<512x128xf32>, vector<64x128xf32> -> vector<64x128xf32>
    %25 = vector.shape_cast %24 : vector<64x128xf32> to vector<8x8x128xf32>
    %c0_3 = arith.constant 0 : index
    %c0_4 = arith.constant 0 : index
    %c0_5 = arith.constant 0 : index
    %26 = vector.load %arg3[%c0_3, %c0_4, %c0_5] : memref<1x8x128xf32, #tpu.memory_space<vmem>>, vector<1x8x128xf32>
    %27 = vector.broadcast %26 : vector<1x8x128xf32> to vector<8x8x128xf32>
    %28 = arith.addf %25, %27 : vector<8x8x128xf32>
    %cst_6 = arith.constant dense<0xFF800000> : vector<8x128xf32>
    %29 = vector.multi_reduction <maximumf>, %28, %cst_6 [1] : vector<8x8x128xf32> to vector<8x128xf32>
    %c0_7 = arith.constant 0 : index
    %c0_8 = arith.constant 0 : index
    %30 = vector.load %arg4[%c0_7, %c0_8] : memref<128x128xf32, #tpu.memory_space<vmem>>, vector<128x128xf32>
    %cst_9 = arith.constant dense<0.000000e+00> : vector<8x128xf32>
    %31 = tpu.matmul %29, %30, %cst_9 {dimension_numbers = #tpu.dot_dimension_numbers<[1], [0], [0], [1], [0, 0, 1, 1], [], []>} : vector<8x128xf32>, vector<128x128xf32>, vector<8x128xf32> -> vector<8x128xf32>
    %c0_10 = arith.constant 0 : index
    %c0_11 = arith.constant 0 : index
    %32 = vector.load %arg5[%c0_10, %c0_11] : memref<1x128xf32, #tpu.memory_space<vmem>>, vector<1x128xf32>
    %33 = vector.broadcast %32 : vector<1x128xf32> to vector<8x128xf32>
    %34 = arith.addf %31, %33 : vector<8x128xf32>
    %c0_12 = arith.constant 0 : index
    %c0_13 = arith.constant 0 : index
    %35 = vector.load %arg6[%c0_12, %c0_13] : memref<8x128xf32, #tpu.memory_space<vmem>>, vector<8x128xf32>
    tpu.vector_store %arg6[%c0_12, %c0_13], %34 {strides = array<i32>} : memref<8x128xf32, #tpu.memory_space<vmem>>, vector<8x128xf32>,
    return
  }
  func.func @transform_0(%arg0: i32) -> (i32, i32) {
    %c0_i32 = arith.constant 0 : i32
    %c0_i32_0 = arith.constant 0 : i32
    return %arg0, %c0_i32 : i32, i32
  }
  func.func @transform_1(%arg0: i32) -> (i32, i32) {
    %c0_i32 = arith.constant 0 : i32
    %c0_i32_0 = arith.constant 0 : i32
    %c0_i32_1 = arith.constant 0 : i32
    return %c0_i32, %c0_i32_0 : i32, i32
  }
  func.func @transform_2(%arg0: i32) -> (i32, i32, i32) {
    %c0_i32 = arith.constant 0 : i32
    %c0_i32_0 = arith.constant 0 : i32
    %c0_i32_1 = arith.constant 0 : i32
    %c0_i32_2 = arith.constant 0 : i32
    return %c0_i32, %c0_i32_0, %c0_i32_1 : i32, i32, i32
  }
  func.func @transform_3(%arg0: i32) -> (i32, i32) {
    %c0_i32 = arith.constant 0 : i32
    %c0_i32_0 = arith.constant 0 : i32
    %c0_i32_1 = arith.constant 0 : i32
    return %c0_i32, %c0_i32_0 : i32, i32
  }
  func.func @transform_4(%arg0: i32) -> (i32, i32) {
    %c0_i32 = arith.constant 0 : i32
    %c0_i32_0 = arith.constant 0 : i32
    %c0_i32_1 = arith.constant 0 : i32
    return %c0_i32, %c0_i32_0 : i32, i32
  }
  func.func @transform_5(%arg0: i32) -> (i32, i32) {
    %c0_i32 = arith.constant 0 : i32
    %c0_i32_0 = arith.constant 0 : i32
    return %arg0, %c0_i32 : i32, i32
  }
}

</mosaic_0001>

<bundles_post_ra>
// kernel: textcnn_forward.1
= control target key start
LH: loop header
LB: loop body
LE: loop exit
PB: predicated region body
PF: predicated region fallthrough
CT: control target
= control target key end

     0   :  { %10 = vsyncpa [#allocation3], 0  ;;  %s978_s18 = smov [#allocation2]   ;;  %s1208_s0 = inlined_call_operand.vmem [shape: s32[64,4], index: 0, kind: input, shape index: {}]   ;;  %s1209_s1 = inlined_call_operand.hbm [shape: f32[512,128], index: 1, kind: input, shape index: {}]   ;;  %s1210_s2 = inlined_call_operand.vmem [shape: f32[1,8,128], index: 2, kind: input, shape index: {}]   ;;  %s1211_s3 = inlined_call_operand.vmem [shape: f32[128,128], index: 3, kind: input, shape index: {}]   ;;  %s1212_s4 = inlined_call_operand.vmem [shape: f32[1,128], index: 4, kind: input, shape index: {}]   ;;  %s1213_s5 = inlined_call_operand.vmem [shape: f32[8,128], index: 5, kind: output, shape index: {}]  }
   0x1   :  { %s18_s19 = sshll.u32 %s978_s18, 4  ;;  %s19_s19 = int_to_ptr.vmem [resolvable:$true] %s18_s19 }
   0x2   :  { %s964_s20 = scalar_lea.vmem %s19_s19, 8192  ;;  %p969_p1 = scmp.lt.s32.totalorder %s19_s19, %s19_s19 }
   0x3   :  { %p965_p0 = scmp.ne.s32.totalorder %s19_s19, %s964_s20  ;;  %p970_p2 = scmp.lt.s32.totalorder %s964_s20, %s964_s20 }
   0x5   :  { %p971_p3 = por %p970_p2, %p969_p1 }
   0x7   :  { %p972_p4 = pnand %p971_p3, %p965_p0 }
   0x9   :  { %975 = shalt.err (!%p972_p4)
}
   0xa   :  { %s979_s21 = smov 128   ;;  %s980_s22 = smov 8  }
   0xb   :  { %24 = dma.hbm_to_vmem [thread:$0]  %s1209_s1, 8192, %s19_s19, [#allocation3], %s979_s21, %s979_s21, %s980_s22  }
   0xc   :  { %976 = dma.done.wait [#allocation3], 8192  }
   0xd   :  { %977 = vsyncadd [#allocation3], 4294959104  ;;  %v981_v0 = vmov 3   ;;  %v982_v1 = vmov 0   ;;  %v34_v2 = vld [vmem:[%s1208_s0] sm:$0xff]  ;;  %v35_v3 = vld [vmem:[%s1208_s0 + $0x8] sm:$0xff] }
   0xe   :  { %928 = vset.pattern.permute.xlu0 %v981_v0  ;;  %929 = vset.pattern.permute.xlu1 %v982_v1  ;;  %v299_v4 = vld [vmem:[#allocation2 + $0x1f8] sm:$0xff]  ;;  %v298_v6 = vld [vmem:[#allocation2 + $0x1f0] sm:$0xff]  ;;  %v983_v9 = vmov 2   ;;  %v297_v10 = vld [vmem:[#allocation2 + $0x1e8] sm:$0xff]  ;;  %v984_v14 = vmov 1  }
   0xf   :  { %45 = vperm.xlu1 %929, %v34_v2   ;;  %189 = vperm.xlu0 %928, %v34_v2   ;;  %v283_v5 = vld [vmem:[#allocation2 + $0x178] sm:$0xff]  ;;  %v282_v7 = vld [vmem:[#allocation2 + $0x170] sm:$0xff]  ;;  %v281_v12 = vld [vmem:[#allocation2 + $0x168] sm:$0xff] }
  0x10   :  { %810 = vmatprep.subr.mxu1 %v299_v4  ;;  %v267_v8 = vld [vmem:[#allocation2 + $0xf8] sm:$0xff]  ;;  %v296_v13 = vld [vmem:[#allocation2 + $0x1e0] sm:$0xff]  ;;  %v266_v15 = vld [vmem:[#allocation2 + $0xf0] sm:$0xff] }
  0x11   :  { %811 = vmatpush3.msra.mxu1 %v283_v5  ;;  %v251_v11 = vld [vmem:[#allocation2 + $0x78] sm:$0xff]  ;;  %754 = vmatprep.subr.mxu0 %v267_v8  ;;  %v280_v16 = vld [vmem:[#allocation2 + $0x160] sm:$0xff]  ;;  %v250_v17 = vld [vmem:[#allocation2 + $0x70] sm:$0xff] }
  0x12   :  { %812 = vmatprep.subr.mxu1 %v298_v6  ;;  %755 = vmatpush3.msra.mxu0 %v251_v11  ;;  %v295_v18 = vld [vmem:[#allocation2 + $0x1d8] sm:$0xff]  ;;  %v1035_v19 = vld [vmem:[%s1208_s0 + $0x20] sm:$0xff]  ;;  %v265_v20 = vld [vmem:[#allocation2 + $0xe8] sm:$0xff] }
  0x13   :  { %930 = vset.pattern.permute.xlu1 %v983_v9  ;;  %192 = vperm.xlu0 %928, %v35_v3   ;;  %v279_v21 = vld [vmem:[#allocation2 + $0x158] sm:$0xff]  ;;  %v249_v22 = vld [vmem:[#allocation2 + $0x68] sm:$0xff]  ;;  %v294_v23 = vld [vmem:[#allocation2 + $0x1d0] sm:$0xff] }
  0x14   :  { %141 = vperm.xlu1 %930, %v34_v2   ;;  %813 = vmatpush3.msra.mxu1 %v282_v7  ;;  %v264_v24 = vld [vmem:[#allocation2 + $0xe0] sm:$0xff]  ;;  %v278_v25 = vld [vmem:[#allocation2 + $0x150] sm:$0xff]  ;;  %v293_v27 = vld [vmem:[#allocation2 + $0x1c8] sm:$0xff] }
  0x15   :  { %814 = vmatprep.subr.mxu1 %v297_v10  ;;  %756 = vmatprep.subr.mxu0 %v266_v15  ;;  %v248_v26 = vld [vmem:[#allocation2 + $0x60] sm:$0xff]  ;;  %v36_v28 = vld [vmem:[%s1208_s0 + $0x10] sm:$0xff]  ;;  %v263_v29 = vld [vmem:[#allocation2 + $0xd8] sm:$0xff] }
  0x16   :  { %815 = vmatpush3.msra.mxu1 %v281_v12  ;;  %757 = vmatpush3.msra.mxu0 %v250_v17  ;;  %v277_v30 = vld [vmem:[#allocation2 + $0x148] sm:$0xff]  ;;  %v247_v31 = vld [vmem:[#allocation2 + $0x58] sm:$0xff]  ;;  %v292_v32 = vld [vmem:[#allocation2 + $0x1c0] sm:$0xff] }
  0x17   :  { %932 = vset.pattern.permute.xlu0 %v984_v14  ;;  %816 = vmatprep.subr.mxu1 %v296_v13  ;;  %v262_v33 = vld [vmem:[#allocation2 + $0xd0] sm:$0xff]  ;;  %v276_v34 = vld [vmem:[#allocation2 + $0x140] sm:$0xff]  ;;  %v291_v36 = vld [vmem:[#allocation2 + $0x1b8] sm:$0xff] }
  0x18   :  { %931 = vset.pattern.permute.xlu1 %v984_v14  ;;  %93 = vperm.xlu0 %932, %v34_v2   ;;  %v246_v35 = vld [vmem:[#allocation2 + $0x50] sm:$0xff]  ;;  %v261_v37 = vld [vmem:[#allocation2 + $0xc8] sm:$0xff]  ;;  %v275_v38 = vld [vmem:[#allocation2 + $0x138] sm:$0xff] }
  0x19   :  { %96 = vperm.xlu1 %931, %v35_v3   ;;  %817 = vmatpush3.msra.mxu1 %v280_v16  ;;  %v245_v39 = vld [vmem:[#allocation2 + $0x48] sm:$0xff]  ;;  %v290_v40 = vld [vmem:[#allocation2 + $0x1b0] sm:$0xff]  ;;  %v260_v41 = vld [vmem:[#allocation2 + $0xc0] sm:$0xff]  ;;  %v42_v16 = vlaneseq }
  0x1a   :  { %818 = vmatprep.subr.mxu1 %v295_v18  ;;  %758 = vmatprep.subr.mxu0 %v265_v20  ;;  %v274_v42 = vld [vmem:[#allocation2 + $0x130] sm:$0xff]  ;;  %v1050_v43 = vld [vmem:[%s1208_s0 + $0x28] sm:$0xff]  ;;  %v244_v44 = vld [vmem:[#allocation2 + $0x40] sm:$0xff] }
  0x1b   :  { %819 = vmatpush3.msra.mxu1 %v279_v21  ;;  %759 = vmatpush3.msra.mxu0 %v249_v22  ;;  %v289_v45 = vld [vmem:[#allocation2 + $0x1a8] sm:$0xff]  ;;  %v259_v46 = vld [vmem:[#allocation2 + $0xb8] sm:$0xff]  ;;  %v288_v49 = vld [vmem:[#allocation2 + $0x1a0] sm:$0xff]  ;;  %v1085_v17 = vand.u32 127, %v42_v16 }
  0x1c   :  { %105 = vperm.xlu0 %932, %v1035_v19   ;;  %820 = vmatprep.subr.mxu1 %v294_v23  ;;  %v273_v47 = vld [vmem:[#allocation2 + $0x128] sm:$0xff]  ;;  %v243_v48 = vld [vmem:[#allocation2 + $0x38] sm:$0xff]  ;;  %v258_v51 = vld [vmem:[#allocation2 + $0xb0] sm:$0xff] }
  0x1d   :  { %933 = vset.pattern.permute.xlu1 %v982_v1  ;;  %760 = vmatprep.subr.mxu0 %v264_v24  ;;  %v37_v50 = vld [vmem:[%s1208_s0 + $0x18] sm:$0xff]  ;;  %v272_v52 = vld [vmem:[#allocation2 + $0x120] sm:$0xff]  ;;  %v242_v53 = vld [vmem:[#allocation2 + $0x30] sm:$0xff] }
  0x1e   :  { %48 = vperm.xlu1 %933, %v35_v3   ;;  %821 = vmatpush3.msra.mxu1 %v278_v25  ;;  %v287_v54 = vld [vmem:[#allocation2 + $0x198] sm:$0xff]  ;;  %v257_v55 = vld [vmem:[#allocation2 + $0xa8] sm:$0xff]  ;;  %v286_v58 = vld [vmem:[#allocation2 + $0x190] sm:$0xff] }
  0x1f   :  { %761 = vmatpush3.msra.mxu0 %v248_v26  ;;  %822 = vmatprep.subr.mxu1 %v293_v27  ;;  %v271_v56 = vld [vmem:[#allocation2 + $0x118] sm:$0xff]  ;;  %v241_v57 = vld [vmem:[#allocation2 + $0x28] sm:$0xff]  ;;  %v40_v59 = vld [vmem:[%s1208_s0 + $0x30] sm:$0xff] }
  0x20   :  { %940 = vset.pattern.permute.xlu0 %v983_v9  ;;  %762 = vmatprep.subr.mxu0 %v263_v29  ;;  %v256_v60 = vld [vmem:[#allocation2 + $0xa0] sm:$0xff]  ;;  %v270_v61 = vld [vmem:[#allocation2 + $0x110] sm:$0xff]  ;;  %v285_v63 = vld [vmem:[#allocation2 + $0x188] sm:$0xff] }
  0x21   :  { %144 = vperm.xlu0 %940, %v35_v3   ;;  %823 = vmatpush3.msra.mxu1 %v277_v30  ;;  %v240_v62 = vld [vmem:[#allocation2 + $0x20] sm:$0xff]  ;;  %v41_v2 = vld [vmem:[%s1208_s0 + $0x38] sm:$0xff]  ;;  %v269_v4 = vld [vmem:[#allocation2 + $0x108] sm:$0xff] }
  0x22   :  { %934 = vset.pattern.permute.xlu1 %v984_v14  ;;  %763 = vmatpush3.msra.mxu0 %v247_v31  ;;  %v255_v3 = vld [vmem:[#allocation2 + $0x98] sm:$0xff]  ;;  %v284_v6 = vld [vmem:[#allocation2 + $0x180] sm:$0xff]  ;;  %v254_v7 = vld [vmem:[#allocation2 + $0x90] sm:$0xff] }
  0x23   :  { %99 = vperm.xlu1 %934, %v36_v28   ;;  %824 = vmatprep.subr.mxu1 %v292_v32  ;;  %v239_v5 = vld [vmem:[#allocation2 + $0x18] sm:$0xff]  ;;  %v268_v8 = vld [vmem:[#allocation2 + $0x100] sm:$0xff]  ;;  %v238_v10 = vld [vmem:[#allocation2 + $0x10] sm:$0xff] }
  0x24   :  { %764 = vmatprep.subr.mxu0 %v262_v33  ;;  %825 = vmatpush3.msra.mxu1 %v276_v34  ;;  %v253_v11 = vld [vmem:[#allocation2 + $0x88] sm:$0xff]  ;;  %v252_v13 = vld [vmem:[#allocation2 + $0x80] sm:$0xff] }
  0x25   :  { %153 = vperm.xlu0 %940, %v1035_v19   ;;  %765 = vmatpush3.msra.mxu0 %v246_v35  ;;  %v237_v12 = vld [vmem:[#allocation2 + $0x8] sm:$0xff]  ;;  %v236_v15 = vld [vmem:[#allocation2] sm:$0xff] }
  0x26   :  { %826 = vmatprep.subr.mxu1 %v291_v36  ;;  %766 = vmatprep.subr.mxu0 %v261_v37 }
  0x27   :  { %935 = vset.pattern.permute.xlu1 %v981_v0  ;;  %827 = vmatpush3.msra.mxu1 %v275_v38 }
  0x28   :  { %195 = vperm.xlu1 %935, %v36_v28   ;;  %767 = vmatpush3.msra.mxu0 %v245_v39 }
  0x29   :  { %943 = vset.pattern.permute.xlu0 %v982_v1  ;;  %828 = vmatprep.subr.mxu1 %v290_v40 }
  0x2a   :  { %51 = vperm.xlu0 %943, %v36_v28   ;;  %768 = vmatprep.subr.mxu0 %v260_v41 }
  0x2b   :  { %829 = vmatpush3.msra.mxu1 %v274_v42  ;;  %769 = vmatpush3.msra.mxu0 %v244_v44 }
  0x2c   :  { %936 = vset.pattern.permute.xlu1 %v983_v9  ;;  %830 = vmatprep.subr.mxu1 %v289_v45 }
  0x2d   :  { %147 = vperm.xlu1 %936, %v36_v28   ;;  %770 = vmatprep.subr.mxu0 %v259_v46 }
  0x2e   :  { %60 = vperm.xlu0 %943, %v1050_v43   ;;  %831 = vmatpush3.msra.mxu1 %v273_v47  ;;  %v986_v47 = vmov 0.0  }
  0x2f   :  { %771 = vmatpush3.msra.mxu0 %v243_v48  ;;  %832 = vmatprep.subr.mxu1 %v288_v49  ;;  %v582_v48 = vld [vmem:[%s1211_s3 + $0x78] sm:$0xff]  ;;  %v581_v49 = vld [vmem:[%s1211_s3 + $0x70] sm:$0xff] }
  0x30   :  { %772 = vmatprep.subr.mxu0 %v258_v51  ;;  %833 = vmatpush3.msra.mxu1 %v272_v52  ;;  %v579_v51 = vld [vmem:[%s1211_s3 + $0x60] sm:$0xff]  ;;  %v578_v52 = vld [vmem:[%s1211_s3 + $0x58] sm:$0xff] }
  0x31   :  { %937 = vset.pattern.permute.xlu1 %v984_v14  ;;  %773 = vmatpush3.msra.mxu0 %v242_v53  ;;  %v577_v53 = vld [vmem:[%s1211_s3 + $0x50] sm:$0xff] }
  0x32   :  { %102 = vperm.xlu1 %937, %v37_v50   ;;  %946 = vset.pattern.permute.xlu0 %v981_v0 }
  0x33   :  { %198 = vperm.xlu0 %946, %v37_v50   ;;  %834 = vmatprep.subr.mxu1 %v287_v54  ;;  %v576_v54 = vld [vmem:[%s1211_s3 + $0x48] sm:$0xff] }
  0x34   :  { %774 = vmatprep.subr.mxu0 %v257_v55  ;;  %835 = vmatpush3.msra.mxu1 %v271_v56  ;;  %v575_v55 = vld [vmem:[%s1211_s3 + $0x40] sm:$0xff]  ;;  %v574_v56 = vld [vmem:[%s1211_s3 + $0x38] sm:$0xff] }
  0x35   :  { %775 = vmatpush3.msra.mxu0 %v241_v57  ;;  %836 = vmatprep.subr.mxu1 %v286_v58  ;;  %v573_v57 = vld [vmem:[%s1211_s3 + $0x30] sm:$0xff]  ;;  %v572_v58 = vld [vmem:[%s1211_s3 + $0x28] sm:$0xff] }
  0x36   :  { %938 = vset.pattern.permute.xlu1 %v982_v1  ;;  %776 = vmatprep.subr.mxu0 %v256_v60  ;;  %v570_v60 = vld [vmem:[%s1211_s3 + $0x18] sm:$0xff] }
  0x37   :  { %54 = vperm.xlu1 %938, %v37_v50   ;;  %207 = vperm.xlu0 %946, %v40_v59  }
  0x38   :  { %837 = vmatpush3.msra.mxu1 %v270_v61  ;;  %777 = vmatpush3.msra.mxu0 %v240_v62  ;;  %v569_v61 = vld [vmem:[%s1211_s3 + $0x10] sm:$0xff]  ;;  %v568_v62 = vld [vmem:[%s1211_s3 + $0x8] sm:$0xff] }
  0x39   :  { %838 = vmatprep.subr.mxu1 %v285_v63  ;;  %778 = vmatprep.subr.mxu0 %v255_v3  ;;  %v567_v63 = vld [vmem:[%s1211_s3] sm:$0xff] }
  0x3a   :  { %839 = vmatpush3.msra.mxu1 %v269_v4  ;;  %779 = vmatpush3.msra.mxu0 %v239_v5 }
  0x3b   :  { %939 = vset.pattern.permute.xlu1 %v983_v9  ;;  %951 = vset.pattern.permute.xlu0 %v984_v14 }
  0x3c   :  { %150 = vperm.xlu1 %939, %v37_v50   ;;  %114 = vperm.xlu0 %951, %v41_v2   ;;  %v580_v50 = vld [vmem:[%s1211_s3 + $0x68] sm:$0xff] }
  0x3d   :  { %840 = vmatprep.subr.mxu1 %v284_v6  ;;  %780 = vmatprep.subr.mxu0 %v254_v7 }
  0x3e   :  { %841 = vmatpush3.msra.mxu1 %v268_v8  ;;  %781 = vmatpush3.msra.mxu0 %v238_v10 }
  0x3f   :  { %782 = vmatprep.subr.mxu0 %v253_v11 }
  0x40   :  { %941 = vset.pattern.permute.xlu1 %v981_v0  ;;  %954 = vset.pattern.permute.xlu0 %v983_v9 }
  0x41   :  { %201 = vperm.xlu1 %941, %v1035_v19   ;;  %162 = vperm.xlu0 %954, %v41_v2  }
  0x42   :  { %783 = vmatpush3.msra.mxu0 %v237_v12 }
  0x43   :  { %784 = vmatprep.subr.mxu0 %v252_v13 }
  0x44   :  { %785 = vmatpush3.msra.mxu0 %v236_v15 }
  0x45   :  { %942 = vset.pattern.permute.xlu1 %v982_v1  ;;  %955 = vset.pattern.permute.xlu0 %v981_v0 }
  0x46   :  { %57 = vperm.xlu1 %942, %v1035_v19   ;;  %883 = vmatprep.subr.mxu0 %v986_v47 }
  0x4a   :  { %944 = vset.pattern.permute.xlu1 %v984_v14 }
  0x4b   :  { %108 = vperm.xlu1 %944, %v1050_v43  }
  0x4f   :  { %945 = vset.pattern.permute.xlu1 %v981_v0 }
  0x50   :  { %204 = vperm.xlu1 %945, %v1050_v43  }
  0x54   :  { %947 = vset.pattern.permute.xlu1 %v983_v9 }
  0x55   :  { %156 = vperm.xlu1 %947, %v1050_v43  }
  0x59   :  { %948 = vset.pattern.permute.xlu1 %v984_v14  ;;  %v985_v14 = vmov 1.0  }
  0x5a   :  { %111 = vperm.xlu1 %948, %v40_v59  }
  0x5e   :  { %949 = vset.pattern.permute.xlu1 %v982_v1 }
  0x5f   :  { %63 = vperm.xlu1 %949, %v40_v59  }
  0x63   :  { %950 = vset.pattern.permute.xlu1 %v983_v9 }
  0x64   :  { %159 = vperm.xlu1 %950, %v40_v59   ;;  %v571_v59 = vld [vmem:[%s1211_s3 + $0x20] sm:$0xff] }
  0x68   :  { %952 = vset.pattern.permute.xlu1 %v981_v0 }
  0x69   :  { %210 = vperm.xlu1 %952, %v41_v2  }
  0x6d   :  { %953 = vset.pattern.permute.xlu1 %v982_v1 }
  0x6e   :  { %66 = vperm.xlu1 %953, %v41_v2  }
  0x8a   :  { %v46_v18 = vpop.permute.xlu1 %45  ;;  %v190_v19 = vpop.permute.xlu0 %189 }
  0x8b   :  { %vm212_vm0 = vcmp.eq.s32.totalorder %v190_v19, %v1085_v17  ;;  %vm68_vm4 = vcmp.eq.s32.totalorder %v46_v18, %v1085_v17 }
  0x8c   :  { %737 = vmatprep.mubr.msk.f32.mxu1 %vm212_vm0, %v985_v14 }
  0x8e   :  { %v193_v20 = vpop.permute.xlu0 %192 }
  0x8f   :  { %v142_v21 = vpop.permute.xlu1 %141  ;;  %vm213_vm1 = vcmp.eq.s32.totalorder %v193_v20, %v1085_v17 }
  0x90   :  { %vm164_vm2 = vcmp.eq.s32.totalorder %v142_v21, %v1085_v17 }
  0x91   :  { %738 = vmatmul.mubr.msk.f32.vlgmr.msra.gmra.mxu1 %vm164_vm2, %v985_v14 }
  0x92   :  { %739 = vmatprep.mubr.msk.f32.mxu1 %vm213_vm1, %v985_v14 }
  0x93   :  { %v94_v0 = vpop.permute.xlu0 %93 }
  0x94   :  { %v97_v1 = vpop.permute.xlu1 %96  ;;  %vm116_vm3 = vcmp.eq.s32.totalorder %v94_v0, %v1085_v17 }
  0x95   :  { %vm117_vm5 = vcmp.eq.s32.totalorder %v97_v1, %v1085_v17  ;;  %721 = vmatprep.mubr.msk.f32.mxu0 %vm116_vm3, %v985_v14 }
  0x96   :  { %722 = vmatmul.mubr.msk.f32.vlgmr.msra.gmra.mxu0 %vm68_vm4, %v985_v14 }
  0x97   :  { %723 = vmatprep.mubr.msk.f32.mxu0 %vm117_vm5, %v985_v14  ;;  %v106_v9 = vpop.permute.xlu0 %105  ;;  %884 = vmatpush3.msra.mxu0 %v582_v48 }
  0x98   :  { %vm120_vm14 = vcmp.eq.s32.totalorder %v106_v9, %v1085_v17  ;;  %885 = vmatprep.subr.mxu0 %v986_v47 }
  0x99   :  { %v49_v22 = vpop.permute.xlu1 %48  ;;  %886 = vmatpush3.msra.mxu0 %v581_v49 }
  0x9a   :  { %vm69_vm6 = vcmp.eq.s32.totalorder %v49_v22, %v1085_v17  ;;  %887 = vmatprep.subr.mxu0 %v986_v47 }
  0x9b   :  { %724 = vmatmul.mubr.msk.f32.gmra.mxu0 %vm69_vm6, %v985_v14 }
  0x9c   :  { %v145_v23 = vpop.permute.xlu0 %144  ;;  %888 = vmatpush3.msra.mxu0 %v580_v50 }
  0x9d   :  { %vm165_vm7 = vcmp.eq.s32.totalorder %v145_v23, %v1085_v17  ;;  %889 = vmatprep.subr.mxu0 %v986_v47 }
  0x9e   :  { %v100_v24 = vpop.permute.xlu1 %99  ;;  %740 = vmatmul.mubr.msk.f32.gmra.mxu1 %vm165_vm7, %v985_v14  ;;  %890 = vmatpush3.msra.mxu0 %v579_v51 }
  0x9f   :  { %vm118_vm8 = vcmp.eq.s32.totalorder %v100_v24, %v1085_v17  ;;  %891 = vmatprep.subr.mxu0 %v986_v47 }
  0xa0   :  { %725 = vmatprep.mubr.msk.f32.mxu0 %vm118_vm8, %v985_v14  ;;  %v154_v25 = vpop.permute.xlu0 %153  ;;  %892 = vmatpush3.msra.mxu0 %v578_v52 }
  0xa1   :  { %vm168_vm1 = vcmp.eq.s32.totalorder %v154_v25, %v1085_v17  ;;  %893 = vmatprep.subr.mxu0 %v986_v47 }
  0xa2   :  { %894 = vmatpush3.msra.mxu0 %v577_v53 }
  0xa3   :  { %v196_v26 = vpop.permute.xlu1 %195  ;;  %895 = vmatprep.subr.mxu0 %v986_v47 }
  0xa4   :  { %vm214_vm9 = vcmp.eq.s32.totalorder %v196_v26, %v1085_v17  ;;  %896 = vmatpush3.msra.mxu0 %v576_v54 }
  0xa5   :  { %741 = vmatprep.mubr.msk.f32.mxu1 %vm214_vm9, %v985_v14  ;;  %v52_v27 = vpop.permute.xlu0 %51  ;;  %897 = vmatprep.subr.mxu0 %v986_v47 }
  0xa6   :  { %vm70_vm10 = vcmp.eq.s32.totalorder %v52_v27, %v1085_v17  ;;  %898 = vmatpush3.msra.mxu0 %v575_v55 }
  0xa7   :  { %726 = vmatmul.mubr.msk.f32.gmra.mxu0 %vm70_vm10, %v985_v14  ;;  %899 = vmatprep.subr.mxu0 %v986_v47 }
  0xa8   :  { %v148_v28 = vpop.permute.xlu1 %147  ;;  %900 = vmatpush3.msra.mxu0 %v574_v56 }
  0xa9   :  { %vm166_vm11 = vcmp.eq.s32.totalorder %v148_v28, %v1085_v17  ;;  %v61_v29 = vpop.permute.xlu0 %60  ;;  %901 = vmatprep.subr.mxu0 %v986_v47 }
  0xaa   :  { %742 = vmatmul.mubr.msk.f32.gmra.mxu1 %vm166_vm11, %v985_v14  ;;  %vm73_vm4 = vcmp.eq.s32.totalorder %v61_v29, %v1085_v17  ;;  %902 = vmatpush3.msra.mxu0 %v573_v57 }
  0xab   :  { %903 = vmatprep.subr.mxu0 %v986_v47 }
  0xac   :  { %904 = vmatpush3.msra.mxu0 %v572_v58 }
  0xad   :  { %v103_v30 = vpop.permute.xlu1 %102  ;;  %905 = vmatprep.subr.mxu0 %v986_v47 }
  0xae   :  { %vm119_vm12 = vcmp.eq.s32.totalorder %v103_v30, %v1085_v17  ;;  %v199_v31 = vpop.permute.xlu0 %198  ;;  %906 = vmatpush3.msra.mxu0 %v571_v59 }
  0xaf   :  { %727 = vmatprep.mubr.msk.f32.mxu0 %vm119_vm12, %v985_v14  ;;  %vm215_vm13 = vcmp.eq.s32.totalorder %v199_v31, %v1085_v17  ;;  %907 = vmatprep.subr.mxu0 %v986_v47 }
  0xb0   :  { %743 = vmatprep.mubr.msk.f32.mxu1 %vm215_vm13, %v985_v14  ;;  %908 = vmatpush3.msra.mxu0 %v570_v60 }
  0xb1   :  { %909 = vmatprep.subr.mxu0 %v986_v47 }
  0xb2   :  { %v55_v32 = vpop.permute.xlu1 %54  ;;  %v208_v38 = vpop.permute.xlu0 %207  ;;  %910 = vmatpush3.msra.mxu0 %v569_v61 }
  0xb3   :  { %vm71_vm15 = vcmp.eq.s32.totalorder %v55_v32, %v1085_v17  ;;  %vm218_vm7 = vcmp.eq.s32.totalorder %v208_v38, %v1085_v17  ;;  %911 = vmatprep.subr.mxu0 %v986_v47 }
  0xb4   :  { %728 = vmatmul.mubr.msk.f32.gmra.mxu0 %vm71_vm15, %v985_v14 }
  0xb5   :  { %729 = vmatprep.mubr.msk.f32.mxu0 %vm120_vm14, %v985_v14  ;;  %912 = vmatpush3.msra.mxu0 %v568_v62 }
  0xb6   :  { %913 = vmatprep.subr.mxu0 %v986_v47 }
  0xb7   :  { %v151_v33 = vpop.permute.xlu1 %150  ;;  %v115_v41 = vpop.permute.xlu0 %114  ;;  %914 = vmatpush3.msra.mxu0 %v567_v63 }
  0xb8   :  { %vm167_vm0 = vcmp.eq.s32.totalorder %v151_v33, %v1085_v17  ;;  %vm123_vm10 = vcmp.eq.s32.totalorder %v115_v41, %v1085_v17 }
  0xb9   :  { %744 = vmatmul.mubr.msk.f32.gmra.mxu1 %vm167_vm0, %v985_v14  ;;  %vm987_vm0 = vmmov 0  }
  0xbc   :  { %v202_v34 = vpop.permute.xlu1 %201  ;;  %v163_v44 = vpop.permute.xlu0 %162 }
  0xbd   :  { %vm216_vm2 = vcmp.eq.s32.totalorder %v202_v34, %v1085_v17  ;;  %vm171_vm13 = vcmp.eq.s32.totalorder %v163_v44, %v1085_v17 }
  0xbe   :  { %745 = vmatprep.mubr.msk.f32.mxu1 %vm216_vm2, %v985_v14  ;;  %vm600_vm2 = vcmask 1042434  }
  0xbf   :  { %746 = vmatmul.mubr.msk.f32.gmra.mxu1 %vm168_vm1, %v985_v14  ;;  %vm598_vm1 = vcmask 1041409  }
  0xc1   :  { %v58_v35 = vpop.permute.xlu1 %57 }
  0xc2   :  { %vm72_vm3 = vcmp.eq.s32.totalorder %v58_v35, %v1085_v17 }
  0xc3   :  { %730 = vmatmul.mubr.msk.f32.gmra.mxu0 %vm72_vm3, %v985_v14  ;;  %vm602_vm3 = vcmask 1043459  }
  0xc6   :  { %v109_v36 = vpop.permute.xlu1 %108 }
  0xc7   :  { %vm121_vm5 = vcmp.eq.s32.totalorder %v109_v36, %v1085_v17 }
  0xc8   :  { %731 = vmatprep.mubr.msk.f32.mxu0 %vm121_vm5, %v985_v14  ;;  %vm606_vm5 = vcmask 1045509  }
  0xc9   :  { %732 = vmatmul.mubr.msk.f32.gmra.mxu0 %vm73_vm4, %v985_v14  ;;  %vm604_vm4 = vcmask 1044484  }
  0xcb   :  { %v205_v37 = vpop.permute.xlu1 %204 }
  0xcc   :  { %vm217_vm6 = vcmp.eq.s32.totalorder %v205_v37, %v1085_v17 }
  0xcd   :  { %747 = vmatprep.mubr.msk.f32.mxu1 %vm217_vm6, %v985_v14  ;;  %vm608_vm6 = vcmask 1046534  }
  0xd0   :  { %v157_v39 = vpop.permute.xlu1 %156 }
  0xd1   :  { %vm169_vm8 = vcmp.eq.s32.totalorder %v157_v39, %v1085_v17 }
  0xd2   :  { %748 = vmatmul.mubr.msk.f32.gmra.mxu1 %vm169_vm8, %v985_v14 }
  0xd3   :  { %749 = vmatprep.mubr.msk.f32.mxu1 %vm218_vm7, %v985_v14  ;;  %vm610_vm7 = vcmask 1047559  }
  0xd5   :  { %v112_v40 = vpop.permute.xlu1 %111 }
  0xd6   :  { %vm122_vm9 = vcmp.eq.s32.totalorder %v112_v40, %v1085_v17  ;;  %v510_v40 = vld [vmem:[%s1210_s2] sm:$0xff] }
  0xd7   :  { %733 = vmatprep.mubr.msk.f32.mxu0 %vm122_vm9, %v985_v14 }
  0xda   :  { %v64_v42 = vpop.permute.xlu1 %63 }
  0xdb   :  { %vm74_vm11 = vcmp.eq.s32.totalorder %v64_v42, %v1085_v17 }
  0xdc   :  { %734 = vmatmul.mubr.msk.f32.gmra.mxu0 %vm74_vm11, %v985_v14 }
  0xdd   :  { %735 = vmatprep.mubr.msk.f32.mxu0 %vm123_vm10, %v985_v14 }
  0xdf   :  { %v160_v43 = vpop.permute.xlu1 %159 }
  0xe0   :  { %vm170_vm12 = vcmp.eq.s32.totalorder %v160_v43, %v1085_v17 }
  0xe1   :  { %750 = vmatmul.mubr.msk.f32.gmra.mxu1 %vm170_vm12, %v985_v14 }
  0xe4   :  { %v211_v45 = vpop.permute.xlu1 %210 }
  0xe5   :  { %vm219_vm14 = vcmp.eq.s32.totalorder %v211_v45, %v1085_v17 }
  0xe6   :  { %751 = vmatprep.mubr.msk.f32.mxu1 %vm219_vm14, %v985_v14 }
  0xe7   :  { %752 = vmatmul.mubr.msk.f32.gmra.mxu1 %vm171_vm13, %v985_v14 }
  0xe9   :  { %v67_v46 = vpop.permute.xlu1 %66 }
  0xea   :  { %vm75_vm15 = vcmp.eq.s32.totalorder %v67_v46, %v1085_v17 }
  0xeb   :  { %736 = vmatmul.mubr.msk.f32.gmra.mxu0 %vm75_vm15, %v985_v14 }
  0xec   :  { %915 = vmatprep.mubr.msk.f32.mxu0 %vm987_vm0, %v986_v47 }
 0x151   :  { %v842_v2 = vpop.f32.mrf.mxu1 }
 0x153   :  { %v843_v4 = vpop.f32.mrf.mxu1 }
 0x154   :  { %v844_v32 = vadd.f32 %v843_v4, %v842_v2 }
 0x156   :  { %v786_v3 = vpop.f32.mrf.mxu0 }
 0x158   :  { %v787_v5 = vpop.f32.mrf.mxu0 }
 0x159   :  { %v788_v26 = vadd.f32 %v787_v5, %v786_v3 }
 0x15b   :  { %v789_v7 = vpop.f32.mrf.mxu0  ;;  %v472_v37 = vadd.f32 %v844_v32, %v788_v26 }
 0x15d   :  { %v790_v10 = vpop.f32.mrf.mxu0  ;;  %v511_v46 = vadd.f32 %v510_v40, %v472_v37 }
 0x15e   :  { %v845_v6 = vpop.f32.mrf.mxu1  ;;  %v791_v27 = vadd.f32 %v790_v10, %v789_v7 }
 0x15f   :  { %v519_v55 = vrot.slane %v511_v46, 4 }
 0x160   :  { %v846_v8 = vpop.f32.mrf.mxu1 }
 0x161   :  { %v847_v22 = vadd.f32 %v846_v8, %v845_v6  ;;  %v520_v3 = vmax.f32 %v511_v46, %v519_v55 }
 0x163   :  { %v477_v33 = vadd.f32 %v847_v22, %v791_v27 }
 0x165   :  { %v512_v43 = vadd.f32 %v510_v40, %v477_v33 }
 0x167   :  { %v792_v12 = vpop.f32.mrf.mxu0  ;;  %v525_v51 = vrot.slane %v512_v43, 4 }
 0x169   :  { %v793_v15 = vpop.f32.mrf.mxu0  ;;  %v526_v60 = vmax.f32 %v512_v43, %v525_v51 }
 0x16a   :  { %v848_v11 = vpop.f32.mrf.mxu1  ;;  %v794_v23 = vadd.f32 %v793_v15, %v792_v12  ;;  %v521_v15 = vrot.slane %v520_v3, 2 }
 0x16b   :  { %v527_v7 = vrot.slane %v526_v60, 2 }
 0x16c   :  { %v849_v13 = vpop.f32.mrf.mxu1  ;;  %v522_v22 = vmax.f32 %v520_v3, %v521_v15 }
 0x16d   :  { %v850_v24 = vadd.f32 %v849_v13, %v848_v11 }
 0x16f   :  { %v482_v36 = vadd.f32 %v850_v24, %v794_v23 }
 0x171   :  { %v513_v45 = vadd.f32 %v510_v40, %v482_v36 }
 0x173   :  { %v531_v53 = vrot.slane %v513_v45, 4 }
 0x174   :  { %v795_v17 = vpop.f32.mrf.mxu0 }
 0x175   :  { %v532_v63 = vmax.f32 %v513_v45, %v531_v53 }
 0x176   :  { %v796_v19 = vpop.f32.mrf.mxu0 }
 0x177   :  { %v797_v34 = vadd.f32 %v796_v19, %v795_v17  ;;  %v533_v11 = vrot.slane %v532_v63, 2 }
 0x179   :  { %v851_v16 = vpop.f32.mrf.mxu1 }
 0x17b   :  { %v852_v18 = vpop.f32.mrf.mxu1 }
 0x17c   :  { %v853_v28 = vadd.f32 %v852_v18, %v851_v16 }
 0x17e   :  { %v487_v38 = vadd.f32 %v853_v28, %v797_v34 }
 0x17f   :  { %v854_v14 = vpop.f32.mrf.mxu1 }
 0x180   :  { %v514_v47 = vadd.f32 %v510_v40, %v487_v38 }
 0x181   :  { %v855_v21 = vpop.f32.mrf.mxu1 }
 0x182   :  { %v856_v30 = vadd.f32 %v855_v21, %v854_v14  ;;  %v537_v56 = vrot.slane %v514_v47, 4  ;;  %v528_v14 = vmax.f32 %v526_v60, %v527_v7 }
 0x183   :  { %v798_v20 = vpop.f32.mrf.mxu0 }
 0x184   :  { %v538_v4 = vmax.f32 %v514_v47, %v537_v56  ;;  %v529_v26 = vrot.slane %v528_v14, 1  ;;  %v753_v56 = vld [vmem:[%s1212_s4] ss:$0 sm:$0xff] }
 0x185   :  { %v799_v0 = vpop.f32.mrf.mxu0 }
 0x186   :  { %v800_v29 = vadd.f32 %v799_v0, %v798_v20  ;;  %v539_v16 = vrot.slane %v538_v4, 2 }
 0x188   :  { %v492_v41 = vadd.f32 %v856_v30, %v800_v29  ;;  %v540_v23 = vmax.f32 %v538_v4, %v539_v16 }
 0x189   :  { %v801_v9 = vpop.f32.mrf.mxu0 }
 0x18a   :  { %v515_v48 = vadd.f32 %v510_v40, %v492_v41  ;;  %v541_v32 = vrot.slane %v540_v23, 1 }
 0x18b   :  { %v802_v31 = vpop.f32.mrf.mxu0 }
 0x18c   :  { %v803_v39 = vadd.f32 %v802_v31, %v801_v9  ;;  %v543_v59 = vrot.slane %v515_v48, 4  ;;  %v523_v31 = vrot.slane %v522_v22, 1 }
 0x18e   :  { %v544_v6 = vmax.f32 %v515_v48, %v543_v59  ;;  %v524_v41 = vmax.f32 %v522_v22, %v523_v31 }
 0x190   :  { %v545_v18 = vrot.slane %v544_v6, 2 }
 0x192   :  { %v857_v1 = vpop.f32.mrf.mxu1 }
 0x194   :  { %v858_v25 = vpop.f32.mrf.mxu1 }
 0x195   :  { %v859_v35 = vadd.f32 %v858_v25, %v857_v1  ;;  %v534_v1 = vmax.f32 %v532_v63, %v533_v11  ;;  %v546_v25 = vmax.f32 %v544_v6, %v545_v18 }
 0x197   :  { %v497_v44 = vadd.f32 %v859_v35, %v803_v39  ;;  %v535_v29 = vrot.slane %v534_v1, 1  ;;  %v547_v34 = vrot.slane %v546_v25, 1  ;;  %v530_v35 = vmax.f32 %v528_v14, %v529_v26 }
 0x199   :  { %v516_v52 = vadd.f32 %v510_v40, %v497_v44  ;;  %v536_v38 = vmax.f32 %v534_v1, %v535_v29  ;;  %v548_v44 = vmax.f32 %v546_v25, %v547_v34  ;;  %v599_v45 = vsel %vm598_vm1, %v530_v35, %v524_v41 }
 0x19b   :  { %v549_v61 = vrot.slane %v516_v52, 4  ;;  %v601_v47 = vsel %vm600_vm2, %v536_v38, %v599_v45 }
 0x19c   :  { %v804_v42 = vpop.f32.mrf.mxu0 }
 0x19d   :  { %v550_v8 = vmax.f32 %v516_v52, %v549_v61 }
 0x19e   :  { %v805_v49 = vpop.f32.mrf.mxu0 }
 0x19f   :  { %v806_v57 = vadd.f32 %v805_v49, %v804_v42  ;;  %v551_v20 = vrot.slane %v550_v8, 2  ;;  %v542_v42 = vmax.f32 %v540_v23, %v541_v32 }
 0x1a1   :  { %v860_v50 = vpop.f32.mrf.mxu1  ;;  %v552_v27 = vmax.f32 %v550_v8, %v551_v20 }
 0x1a3   :  { %v861_v54 = vpop.f32.mrf.mxu1  ;;  %v553_v36 = vrot.slane %v552_v27, 1 }
 0x1a4   :  { %v862_v58 = vadd.f32 %v861_v54, %v860_v50  ;;  %v603_v50 = vsel %vm602_vm3, %v542_v42, %v601_v47 }
 0x1a5   :  { %v605_v51 = vsel %vm604_vm4, %v548_v44, %v603_v50 }
 0x1a6   :  { %v502_v62 = vadd.f32 %v862_v58, %v806_v57 }
 0x1a7   :  { %v863_v2 = vpop.f32.mrf.mxu1 }
 0x1a8   :  { %v517_v5 = vadd.f32 %v510_v40, %v502_v62 }
 0x1a9   :  { %v864_v13 = vpop.f32.mrf.mxu1 }
 0x1aa   :  { %v555_v10 = vrot.slane %v517_v5, 4  ;;  %v865_v21 = vadd.f32 %v864_v13, %v863_v2 }
 0x1ab   :  { %v807_v12 = vpop.f32.mrf.mxu0 }
 0x1ac   :  { %v556_v17 = vmax.f32 %v517_v5, %v555_v10 }
 0x1ad   :  { %v808_v19 = vpop.f32.mrf.mxu0 }
 0x1ae   :  { %v809_v0 = vadd.f32 %v808_v19, %v807_v12  ;;  %v557_v9 = vrot.slane %v556_v17, 2 }
 0x1b0   :  { %v507_v24 = vadd.f32 %v865_v21, %v809_v0  ;;  %v558_v30 = vmax.f32 %v556_v17, %v557_v9 }
 0x1b2   :  { %v518_v28 = vadd.f32 %v510_v40, %v507_v24  ;;  %v559_v39 = vrot.slane %v558_v30, 1  ;;  %v554_v40 = vmax.f32 %v552_v27, %v553_v36 }
 0x1b4   :  { %v561_v33 = vrot.slane %v518_v28, 4  ;;  %v560_v48 = vmax.f32 %v558_v30, %v559_v39  ;;  %v607_v53 = vsel %vm606_vm5, %v554_v40, %v605_v51 }
 0x1b6   :  { %v562_v37 = vmax.f32 %v518_v28, %v561_v33  ;;  %v609_v54 = vsel %vm608_vm6, %v560_v48, %v607_v53 }
 0x1b8   :  { %v563_v43 = vrot.slane %v562_v37, 2 }
 0x1ba   :  { %v564_v46 = vmax.f32 %v562_v37, %v563_v43 }
 0x1bc   :  { %v565_v49 = vrot.slane %v564_v46, 1 }
 0x1be   :  { %v566_v52 = vmax.f32 %v564_v46, %v565_v49 }
 0x1c0   :  { %v611_v55 = vsel %vm610_vm7, %v566_v52, %v609_v54 }
 0x1c1   :  { %916 = vmatmul.mubr.f32.vlgmr.msra.gmra.mxu0 %v611_v55 }
 0x281   :  { %v679_v57 = vpop.f32.mrf.mxu0 }
 0x282   :  { %v680_v58 = vadd.f32 %v753_v56, %v679_v57 }
 0x283   :  { %v917_v59 = vpop.f32.mrf.mxu0 }
 0x284   :  { %683 = vst [vmem:[%s1213_s5] sm:$0xff] %v680_v58 }
 0x285   :  { %688 = vsyncpa [#allocation3], 1 }

</bundles_post_ra>
